<compile_context>
chip_gen: v5e
topology: v5e:2x2
jax: 0.10.0
libtpu: 0.0.40
codegen_flags: <defaults>
</compile_context>

<pallas_src>
import jax
import jax.numpy as jnp
from jax.experimental import pallas as pl
from jax.experimental.pallas import tpu as pltpu

_INV_SQRT2 = 0.7071067811865476
_MIB = 1024 * 1024


def _gelu_exact_f32(h):
    # Exact (erf-based) GELU in fp32, matching torch.nn.GELU() default.
    return 0.5 * h * (1.0 + jax.lax.erf(h * jnp.float32(_INV_SQRT2)))


def _ffn_resident_kernel(x_ref, w1_ref, b1_ref, w2_ref, b2_ref, o_ref):
    # x_ref: (tm, dim_p)   w1_ref: (dim_p, hidden_p)   b1_ref: (1, hidden_p)
    # w2_ref: (hidden_p, dim_p)   b2_ref: (1, dim_p)   o_ref: (tm, dim_p)
    h = jnp.dot(x_ref[...], w1_ref[...], preferred_element_type=jnp.float32)
    h = _gelu_exact_f32(h + b1_ref[...].astype(jnp.float32))
    # TODO(synk): Dropout layers have p=0.0 (identity); non-zero p would need pltpu.prng_* masking.
    out = jnp.dot(h.astype(w2_ref.dtype), w2_ref[...], preferred_element_type=jnp.float32)
    o_ref[...] = (out + b2_ref[...].astype(jnp.float32)).astype(o_ref.dtype)


def _ffn_streaming_kernel(x_ref, w1_ref, b1_ref, w2_ref, b2_ref, o_ref, acc_ref):
    # x_ref: (tm, dim_p)   w1_ref: (dim_p, th)   b1_ref: (1, th)
    # w2_ref: (th, dim_p)  b2_ref: (1, dim_p)    o_ref: (tm, dim_p)
    # acc_ref: (tm, dim_p) fp32 accumulator over hidden tiles.
    h_idx = pl.program_id(1)

    @pl.when(h_idx == 0)
    def _():
        acc_ref[...] = jnp.zeros_like(acc_ref)

    h = jnp.dot(x_ref[...], w1_ref[...], preferred_element_type=jnp.float32)
    h = _gelu_exact_f32(h + b1_ref[...].astype(jnp.float32))
    # TODO(synk): Dropout layers have p=0.0 (identity); non-zero p would need pltpu.prng_* masking.
    acc_ref[...] += jnp.dot(h.astype(w2_ref.dtype), w2_ref[...],
                            preferred_element_type=jnp.float32)

    @pl.when(h_idx == pl.num_programs(1) - 1)
    def _():
        o_ref[...] = (acc_ref[...] + b2_ref[...].astype(jnp.float32)).astype(o_ref.dtype)


def _round_up(a, b):
    return ((a + b - 1) // b) * b


def _physical_vmem_bytes():
    try:
        info = pltpu.get_tpu_info()
        for attr in ("vmem_capacity_bytes", "vmem_size_bytes", "vmem_bytes"):
            v = getattr(info, attr, None)
            if v:
                return int(v)
    except Exception:
        pass
    return 64 * _MIB  # conservative fallback = v7x per-TensorCore VMEM


def _pick_row_tiling(M, tm_cap, prefer_two_tiles):
    """Choose (tm, M_padded): tm is a multiple of 8 that divides M_padded."""
    M8 = _round_up(max(M, 1), 8)
    tm = max(8, (min(tm_cap, M8) // 8) * 8)
    if prefer_two_tiles and M8 >= 16:
        tm = min(tm, _round_up(pl.cdiv(M8, 2), 8))
    # Prefer a tm that divides the 8-aligned row count exactly (no extra row padding),
    # as long as it doesn't shrink the tile by more than ~2x.
    for cand in range(tm, max(8, tm // 2) - 1, -8):
        if M8 % cand == 0:
            return cand, M8
    return tm, _round_up(M8, tm)


def feed_forward(x, w1, b1, w2, b2):
    """x: (..., dim). Returns array of same shape/dtype with PyTorch FeedForward semantics."""
    orig_shape = x.shape
    dim = orig_shape[-1]
    hidden = w1.shape[1]
    x2d = x.reshape(-1, dim)
    M = x2d.shape[0]

    s_x = jnp.dtype(x.dtype).itemsize
    s_w = jnp.dtype(w1.dtype).itemsize

    dim_p = _round_up(dim, 128)
    hidden_p = _round_up(hidden, 128)

    # --- Per-generation VMEM budget (v7x: 64 MiB physical, v5e/v6e: 128 MiB). ---
    phys = _physical_vmem_bytes()
    vmem_budget = int(phys * 0.80)          # ~51 MiB on v7x, ~102 MiB on v5e/v6e
    avail = vmem_budget - 4 * _MIB          # headroom for Mosaic internal scratch / semaphores
    big_chip = phys > 96 * _MIB

    weight_bytes = 2 * dim_p * hidden_p * s_w   # W1 + W2 (padded)

    # --- Mode A: weights resident in VMEM (DMA'd once per call). ---
    resident = (2 * weight_bytes) <= avail // 2    # 2x: pipeline double-buffering
    tm = th = None
    if resident:
        leftover = avail - 2 * weight_bytes
        # x + out (double-buffered, native dtype) + fp32 intermediate h (tm, hidden_p).
        per_row = 4 * dim_p * s_x + 4 * hidden_p
        tm_fit = (leftover // per_row) // 8 * 8
        if tm_fit >= 8:
            tm, M_pad = _pick_row_tiling(M, min(512, tm_fit), prefer_two_tiles=True)
        else:
            resident = False

    # --- Mode B: stream W1 column-tiles / W2 row-tiles over a hidden grid axis. ---
    if not resident:
        tm_target = 768 if big_chip else 512
        th_cands = [t for t in range(min(1024, hidden_p), 127, -128) if hidden_p % t == 0]
        best = None
        for th_c in th_cands:
            w_tile_bytes = 2 * 2 * dim_p * th_c * s_w      # W1 + W2 tiles, double-buffered
            leftover = avail - w_tile_bytes
            if leftover <= 0:
                continue
            # x + out (double-buffered) + fp32 accumulator (tm, dim_p) + fp32 h tile (tm, th).
            per_row = 4 * dim_p * s_x + 4 * dim_p + 4 * th_c
            tm_fit = min(tm_target, (leftover // per_row) // 8 * 8)
            if tm_fit < 8:
                continue
            if best is None or tm_fit > best[0]:
                best = (tm_fit, th_c)
            if tm_fit >= tm_target:
                break                                       # largest th that still reaches tm_target
        if best is None:
            best = (8, 128)
        tm_cap, th = best
        tm, M_pad = _pick_row_tiling(M, tm_cap, prefer_two_tiles=False)

    # --- Pad only when needed (aligned shapes skip the extra HBM pass entirely). ---
    need_row_pad = (M_pad != M)
    need_dim_pad = (dim_p != dim)
    need_hidden_pad = (hidden_p != hidden)

    if need_row_pad or need_dim_pad:
        x_in = jnp.zeros((M_pad, dim_p), x.dtype).at[:M, :dim].set(x2d)
    else:
        x_in = x2d
    if need_dim_pad or need_hidden_pad:
        w1_in = jnp.zeros((dim_p, hidden_p), w1.dtype).at[:dim, :hidden].set(w1)
        w2_in = jnp.zeros((hidden_p, dim_p), w2.dtype).at[:hidden, :dim].set(w2)
        b1_in = jnp.zeros((1, hidden_p), b1.dtype).at[0, :hidden].set(b1)
        b2_in = jnp.zeros((1, dim_p), b2.dtype).at[0, :dim].set(b2)
    else:
        w1_in, w2_in = w1, w2
        b1_in = b1.reshape(1, hidden_p)
        b2_in = b2.reshape(1, dim_p)

    n_row_tiles = M_pad // tm

    # Honest HBM-traffic estimate (mode B re-streams the weights once per row tile).
    w_stream_bytes = weight_bytes if resident else n_row_tiles * weight_bytes
    cost = pl.CostEstimate(
        flops=4 * M_pad * dim_p * hidden_p,                 # two matmuls
        transcendentals=M_pad * hidden_p,                   # erf in the GELU
        bytes_accessed=(2 * M_pad * dim_p * s_x             # x + out
                        + w_stream_bytes
                        + hidden_p * jnp.dtype(b1.dtype).itemsize
                        + dim_p * jnp.dtype(b2.dtype).itemsize),
    )

    if resident:
        grid_spec = pltpu.PrefetchScalarGridSpec(
            num_scalar_prefetch=0,
            grid=(n_row_tiles,),
            in_specs=[
                pl.BlockSpec((tm, dim_p), lambda i: (i, 0)),          # x row tile
                pl.BlockSpec((dim_p, hidden_p), lambda i: (0, 0)),    # W1 (resident)
                pl.BlockSpec((1, hidden_p), lambda i: (0, 0)),        # b1 (resident)
                pl.BlockSpec((hidden_p, dim_p), lambda i: (0, 0)),    # W2 (resident)
                pl.BlockSpec((1, dim_p), lambda i: (0, 0)),           # b2 (resident)
            ],
            out_specs=pl.BlockSpec((tm, dim_p), lambda i: (i, 0)),
        )
        kernel = _ffn_resident_kernel
        dim_sem = ("parallel",)
    else:
        grid_spec = pltpu.PrefetchScalarGridSpec(
            num_scalar_prefetch=0,
            grid=(n_row_tiles, hidden_p // th),
            in_specs=[
                pl.BlockSpec((tm, dim_p), lambda i, h: (i, 0)),       # x row tile (constant in h)
                pl.BlockSpec((dim_p, th), lambda i, h: (0, h)),       # W1 column tile
                pl.BlockSpec((1, th), lambda i, h: (0, h)),           # b1 tile
                pl.BlockSpec((th, dim_p), lambda i, h: (h, 0)),       # W2 row tile
                pl.BlockSpec((1, dim_p), lambda i, h: (0, 0)),        # b2 (resident)
            ],
            out_specs=pl.BlockSpec((tm, dim_p), lambda i, h: (i, 0)),
            scratch_shapes=[pltpu.VMEM((tm, dim_p), jnp.float32)],
        )
        kernel = _ffn_streaming_kernel
        dim_sem = ("parallel", "arbitrary")

    out_p = pl.pallas_call(
        kernel,
        out_shape=jax.ShapeDtypeStruct((M_pad, dim_p), x.dtype),
        grid_spec=grid_spec,
        compiler_params=pltpu.CompilerParams(
            dimension_semantics=dim_sem,
            vmem_limit_bytes=vmem_budget,
        ),
        cost_estimate=cost,
    )(x_in, w1_in, b1_in, w2_in, b2_in)

    if need_row_pad or need_dim_pad:
        out_p = out_p[:M, :dim]
    return out_p.reshape(orig_shape)


def _reference(x, w1, b1, w2, b2):
    xf = x.reshape(-1, x.shape[-1]).astype(jnp.float32)
    h = xf @ w1.astype(jnp.float32) + b1.astype(jnp.float32)
    h = 0.5 * h * (1.0 + jax.lax.erf(h / jnp.sqrt(2.0)))
    o = h @ w2.astype(jnp.float32) + b2.astype(jnp.float32)
    return o.reshape(x.shape).astype(x.dtype)


if __name__ == "__main__":
    # Small shapes consistent with the module: tokens of width `dim`, hidden width `hidden_dim`.
    batch, seq, dim, hidden_dim = 2, 8, 32, 64

    key = jax.random.PRNGKey(0)
    kx, kw1, kb1, kw2, kb2 = jax.random.split(key, 5)

    x = jax.random.normal(kx, (batch, seq, dim), dtype=jnp.float32)

    # Deterministic parameter init; shapes match nn.Linear(dim, hidden_dim) / nn.Linear(hidden_dim, dim)
    # (stored transposed vs. PyTorch so the kernel does row-major matmuls).
    w1 = jax.random.normal(kw1, (dim, hidden_dim), dtype=jnp.float32) * 0.05
    b1 = jax.random.normal(kb1, (hidden_dim,), dtype=jnp.float32) * 0.05
    w2 = jax.random.normal(kw2, (hidden_dim, dim), dtype=jnp.float32) * 0.05
    b2 = jax.random.normal(kb2, (dim,), dtype=jnp.float32) * 0.05

    out = feed_forward(x, w1, b1, w2, b2)
    out = jax.block_until_ready(out)

    ref = _reference(x, w1, b1, w2, b2)
    assert out.shape == x.shape and out.dtype == x.dtype
    assert jnp.allclose(out, ref, atol=1e-5, rtol=1e-5), "mismatch vs reference"

    print("KERNEL_OK")
</pallas_src>

<mosaic_0001>
module attributes {stable_mosaic.version = 11 : i64} {
  func.func @_ffn_resident_kernel(%arg0: i32, %arg1: memref<8x128xf32, #tpu.memory_space<vmem>>, %arg2: memref<128x128xf32, #tpu.memory_space<vmem>>, %arg3: memref<1x128xf32, #tpu.memory_space<vmem>>, %arg4: memref<128x128xf32, #tpu.memory_space<vmem>>, %arg5: memref<1x128xf32, #tpu.memory_space<vmem>>, %arg6: memref<8x128xf32, #tpu.memory_space<vmem>>) attributes {dimension_semantics = [#tpu.dimension_semantics<parallel>], iteration_bounds = array<i64: 2>, scalar_prefetch = 0 : i64, scratch_operands = 0 : i64, tpu.core_type = #tpu.core_type<tc>, window_params = [{transform_indices = @transform_0, window_bounds = array<i64: 8, 128>}, {pipeline_mode = #tpu.pipeline_mode<synchronous>, transform_indices = @transform_1, window_bounds = array<i64: 128, 128>}, {pipeline_mode = #tpu.pipeline_mode<synchronous>, transform_indices = @transform_2, window_bounds = array<i64: 1, 128>}, {pipeline_mode = #tpu.pipeline_mode<synchronous>, transform_indices = @transform_3, window_bounds = array<i64: 128, 128>}, {pipeline_mode = #tpu.pipeline_mode<synchronous>, transform_indices = @transform_4, window_bounds = array<i64: 1, 128>}, {transform_indices = @transform_5, window_bounds = array<i64: 8, 128>}]} {
    %c0 = arith.constant 0 : index
    %c0_0 = arith.constant 0 : index
    %0 = vector.load %arg1[%c0, %c0_0] : memref<8x128xf32, #tpu.memory_space<vmem>>, vector<8x128xf32>
    %c0_1 = arith.constant 0 : index
    %c0_2 = arith.constant 0 : index
    %1 = vector.load %arg2[%c0_1, %c0_2] : memref<128x128xf32, #tpu.memory_space<vmem>>, vector<128x128xf32>
    %cst = arith.constant dense<0.000000e+00> : vector<8x128xf32>
    %2 = tpu.matmul %0, %1, %cst {dimension_numbers = #tpu.dot_dimension_numbers<[1], [0], [0], [1], [0, 0, 1, 1], [], []>} : vector<8x128xf32>, vector<128x128xf32>, vector<8x128xf32> -> vector<8x128xf32>
    %c0_3 = arith.constant 0 : index
    %c0_4 = arith.constant 0 : index
    %3 = vector.load %arg3[%c0_3, %c0_4] : memref<1x128xf32, #tpu.memory_space<vmem>>, vector<1x128xf32>
    %4 = vector.broadcast %3 : vector<1x128xf32> to vector<8x128xf32>
    %5 = arith.addf %2, %4 : vector<8x128xf32>
    %cst_5 = arith.constant 5.000000e-01 : f32
    %6 = vector.broadcast %cst_5 : f32 to vector<8x128xf32>
    %7 = arith.mulf %6, %5 : vector<8x128xf32>
    %cst_6 = arith.constant 0.707106769 : f32
    %8 = vector.broadcast %cst_6 : f32 to vector<8x128xf32>
    %9 = arith.mulf %5, %8 : vector<8x128xf32>
    %10 = math.erf %9 : vector<8x128xf32>
    %cst_7 = arith.constant 1.000000e+00 : f32
    %11 = vector.broadcast %cst_7 : f32 to vector<8x128xf32>
    %12 = arith.addf %11, %10 : vector<8x128xf32>
    %13 = arith.mulf %7, %12 : vector<8x128xf32>
    %c0_8 = arith.constant 0 : index
    %c0_9 = arith.constant 0 : index
    %14 = vector.load %arg4[%c0_8, %c0_9] : memref<128x128xf32, #tpu.memory_space<vmem>>, vector<128x128xf32>
    %cst_10 = arith.constant dense<0.000000e+00> : vector<8x128xf32>
    %15 = tpu.matmul %13, %14, %cst_10 {dimension_numbers = #tpu.dot_dimension_numbers<[1], [0], [0], [1], [0, 0, 1, 1], [], []>} : vector<8x128xf32>, vector<128x128xf32>, vector<8x128xf32> -> vector<8x128xf32>
    %c0_11 = arith.constant 0 : index
    %c0_12 = arith.constant 0 : index
    %16 = vector.load %arg5[%c0_11, %c0_12] : memref<1x128xf32, #tpu.memory_space<vmem>>, vector<1x128xf32>
    %17 = vector.broadcast %16 : vector<1x128xf32> to vector<8x128xf32>
    %18 = arith.addf %15, %17 : vector<8x128xf32>
    %c0_13 = arith.constant 0 : index
    %c0_14 = arith.constant 0 : index
    %19 = vector.load %arg6[%c0_13, %c0_14] : memref<8x128xf32, #tpu.memory_space<vmem>>, vector<8x128xf32>
    tpu.vector_store %arg6[%c0_13, %c0_14], %18 {strides = array<i32>} : memref<8x128xf32, #tpu.memory_space<vmem>>, vector<8x128xf32>,
    return
  }
  func.func @transform_0(%arg0: i32) -> (i32, i32) {
    %c0_i32 = arith.constant 0 : i32
    %c0_i32_0 = arith.constant 0 : i32
    return %arg0, %c0_i32 : i32, i32
  }
  func.func @transform_1(%arg0: i32) -> (i32, i32) {
    %c0_i32 = arith.constant 0 : i32
    %c0_i32_0 = arith.constant 0 : i32
    %c0_i32_1 = arith.constant 0 : i32
    return %c0_i32, %c0_i32_0 : i32, i32
  }
  func.func @transform_2(%arg0: i32) -> (i32, i32) {
    %c0_i32 = arith.constant 0 : i32
    %c0_i32_0 = arith.constant 0 : i32
    %c0_i32_1 = arith.constant 0 : i32
    return %c0_i32, %c0_i32_0 : i32, i32
  }
  func.func @transform_3(%arg0: i32) -> (i32, i32) {
    %c0_i32 = arith.constant 0 : i32
    %c0_i32_0 = arith.constant 0 : i32
    %c0_i32_1 = arith.constant 0 : i32
    return %c0_i32, %c0_i32_0 : i32, i32
  }
  func.func @transform_4(%arg0: i32) -> (i32, i32) {
    %c0_i32 = arith.constant 0 : i32
    %c0_i32_0 = arith.constant 0 : i32
    %c0_i32_1 = arith.constant 0 : i32
    return %c0_i32, %c0_i32_0 : i32, i32
  }
  func.func @transform_5(%arg0: i32) -> (i32, i32) {
    %c0_i32 = arith.constant 0 : i32
    %c0_i32_0 = arith.constant 0 : i32
    return %arg0, %c0_i32 : i32, i32
  }
}

</mosaic_0001>

<bundles_post_ra>
// kernel: tpu_custom_call.1
= control target key start
LH: loop header
LB: loop body
LE: loop exit
PB: predicated region body
PF: predicated region fallthrough
CT: control target
= control target key end

     0   :  { %10 = vsyncpa [#allocation3], 0  ;;  %s950_s0 = inlined_call_operand.hbm [shape: f32[16,128], index: 0, kind: input, shape index: {}]   ;;  %s951_s1 = inlined_call_operand.hbm [shape: f32[128,128], index: 1, kind: input, shape index: {}]   ;;  %s952_s2 = inlined_call_operand.vmem [shape: f32[1,128], index: 2, kind: input, shape index: {}]   ;;  %s953_s3 = inlined_call_operand.hbm [shape: f32[128,128], index: 3, kind: input, shape index: {}]   ;;  %s954_s4 = inlined_call_operand.vmem [shape: f32[1,128], index: 4, kind: input, shape index: {}]   ;;  %s955_s5 = inlined_call_operand.hbm [shape: f32[16,128], index: 5, kind: output, shape index: {}]  }
   0x1   :  { %12 = vsyncpa [#allocation3 + $0x1], 0 }
   0x2   :  { %13 = vsyncpa [#allocation6], 0 }
   0x3   :  { %14 = vsyncpa [#allocation4], 0 }
   0x4   :  { %16 = vsyncpa [#allocation4 + $0x1], 0  ;;  %s792_s18 = smov 0   ;;  %s794_s19 = smov 0  }
   0x5   :  { %s796_s20 = smov 0   ;;  %s798_s21 = smov 0  }
   0x6 LB: > { %s174_s24 = sshll.u32 %s951_s1, 4  ;;  %s816_s25 = sadd.s32 4294967295, %s756_s21   ;;  %s756_s21 = sphi %s798_s21, %s966_s21   ;;  %s752_s20 = sphi %s796_s20, %s965_s20   ;;  %s748_s19 = sphi %s794_s19, %s964_s19   ;;  %s744_s18 = sphi %s792_s18, %s963_s18   ;;  %s175_s24 = int_to_ptr.hbm [resolvable:$true] %s174_s24 }
   0x7   : > { %p507_p0 = scmp.ge.s32.totalorder %s756_s21, 1  ;;  %p43_p1 = scmp.eq.s32.totalorder %s816_s25, 0 }
   0x8   : > { %p163_p2 = scmp.lt.s32.totalorder %s756_s21, 3  ;;  %s758_s27 = smov [#allocation5]  }
   0x9   : > { %s176_s28 = sshll.u32 %s758_s27, 4  ;;  %s191_s6 = sshll.u32 %s953_s3, 4  ;;  %s177_s28 = int_to_ptr.vmem [resolvable:$true] %s176_s28  ;;  %s192_s6 = int_to_ptr.hbm [resolvable:$true] %s191_s6 }
   0xa   : > { %p821_p3 = pnand %p507_p0, %p163_p2  ;;  %s759_s7 = smov [#allocation7]  }
   0xb   : > { %s193_s8 = sshll.u32 %s759_s7, 4  ;;  %s760_s9 = smov 128   ;;  %s194_s8 = int_to_ptr.vmem [resolvable:$true] %s193_s8 }
   0xc   : > { %p535_p4 = pneg %p821_p3  ;;  %s761_s10 = smov 8  }
   0xd   : > { %s506_s11 = sadd.s32 4294967294, %s756_s21   ;;  %s835_s12 = sadd.s32 1, %s756_s21  }
   0xe   : > { %p536_p6 = pnand %p535_p4, %p43_p1  ;;  %s26_s13 = ssub.s32 %s756_s21, %s835_s12 }
   0xf   : > { %s29_s14 = sadd.s32 1, %s752_s20  ;;  %p27_p7 = scmp.eq.s32.totalorder %s26_s13, 0 }
  0x10   : > { %538 = dma.hbm_to_vmem [thread:$0]  (!%p536_p6), %s175_s24, 2048, %s177_s28, [#allocation6], %s760_s9, %s760_s9, %s761_s10  }
  0x11   : > { %541 = dma.hbm_to_vmem [thread:$0]  (!%p536_p6), %s192_s6, 2048, %s194_s8, [#allocation6], %s760_s9, %s760_s9, %s761_s10  }
  0x12   : > { %p36_p8 = scmp.ne.s32.totalorder %s752_s20, %s748_s19  ;;  %p37_p9 = scmp.eq.s32.totalorder %s756_s21, 0 }
  0x13   : > { %p42_p10 = scmp.ne.s32.totalorder %s748_s19, %s744_s18  ;;  %p150_p13 = scmp.eq.s32.totalorder %s816_s25, 1 }
  0x14   : > { %s846_s15 = scalar_select %p27_p7, %s752_s20, %s29_s14  }
  0x15   : > { %p848_p11 = por %p37_p9, %p36_p8  ;;  %p854_p12 = por %p43_p1, %p42_p10 }
  0x16   : > { %p156_p0 = scmp.eq.s32.totalorder %s506_s11, 1  ;;  %p552_p2 = scmp.lt.s32.totalorder %s756_s21, 2 }
  0x17   : > { %s210_s22 = sand.u32 1, %s752_s20   ;;  %p861_p4 = por %p150_p13, %p36_p8 }
  0x18   : > { %p865_p6 = por %p156_p0, %p42_p10  ;;  %s511_s27 = sshll.u32 %s210_s22, 3 }
  0x19   : > { %s512_s28 = sshll.u32 %s756_s21, 3  ;;  %s214_s7 = scalar_lea.vmem [#allocation2], %s511_s27 }
  0x1a   : > { %s218_s6 = scalar_lea.hbm %s950_s0, %s512_s28  ;;  %s222_s8 = sshll.u32 %s214_s7, 4  ;;  %s223_s8 = int_to_ptr.vmem [resolvable:$true] %s222_s8 }
  0x1b   : > { %s220_s9 = sshll.u32 %s218_s6, 4  ;;  %p875_p7 = pnand %p552_p2, %p848_p11  ;;  %s221_s9 = int_to_ptr.hbm [resolvable:$true] %s220_s9 }
  0x1c   : > { %s211_s11 = scalar_lea.sflag [#allocation3], %s210_s22  ;;  %s656_s13 = sshra.s32 %s221_s9, 4  ;;  %s657_s13 = int_to_ptr.hbm [resolvable:$true] %s656_s13 }
  0x1d   : > { %s658_s14 = scalar_lea.hbm %s657_s13, 8  ;;  %p660_p9 = pneg %p875_p7 }
  0x1e   : > { %p659_p8 = scmp.ne.s32.totalorder %s657_s13, %s658_s14  ;;  %s663_s29 = scalar_lea.hbm %s950_s0, 16 }
  0x1f   : > { %p664_p11 = scmp.lt.s32.totalorder %s657_s13, %s950_s0  ;;  %p665_p0 = scmp.lt.s32.totalorder %s663_s29, %s658_s14 }
  0x20   : > { %p661_p10 = pnand %p660_p9, %p659_p8 }
  0x21   : > { %p666_p2 = por %p665_p0, %p664_p11 }
  0x22   : > { %p662_p13 = pneg %p661_p10 }
  0x24   : > { %p667_p5 = pnand %p666_p2, %p662_p13 }
  0x26   : > { %670 = shalt.err (!%p667_p5)
}
  0x27   : > { %545 = dma.hbm_to_vmem [thread:$0]  (!%p875_p7), %s221_s9, 128, %s223_s8, %s211_s11  }
  0x28   : > { %231 = sbr.rel (%p821_p3) target bundleno = 390 (0x186), region = 40  ;;  %s892_s22 = sand.u32 (!%p821_p3), 1, %s748_s19  }
  0x29   : > { %s514_s6 = sshll.u32 (!%p821_p3), %s892_s22, 3  ;;  %s234_s7 = scalar_lea.sflag (!%p821_p3), [#allocation3], %s892_s22 }
  0x2a   : > { %s898_s13 = scalar_lea.vmem (!%p821_p3), [#allocation2], %s514_s6 }
  0x2d   : > { %731 = dma.done.wait (%p854_p12), %s234_s7, 128  }
  0x2e   : > { %733 = vsyncadd (%p854_p12), %s234_s7, 4294967168 }
  0x2f   : > { %735 = dma.done.wait (%p43_p1), [#allocation6], 4096  }
  0x30   : > { %737 = vsyncadd (%p43_p1), [#allocation6], 4294963200  ;;  %v291_v0 = vld [vmem:[#allocation5 + $0x78] sm:$0xff]  ;;  %v290_v1 = vld [vmem:[#allocation5 + $0x70] sm:$0xff]  ;;  %s520_s8 = sshll.u32 %s816_s25, 3  ;;  %s274_s28 = scalar_lea.vmem [#allocation8], %s514_s6 }
  0x31   : > { %296 = vmatpush.msra.mxu0 %v291_v0  ;;  %v289_v2 = vld [vmem:[#allocation5 + $0x68] sm:$0xff]  ;;  %v288_v3 = vld [vmem:[#allocation5 + $0x60] sm:$0xff]  ;;  %v287_v4 = vld [vmem:[#allocation5 + $0x58] sm:$0xff]  ;;  %s412_s11 = scalar_lea.hbm %s955_s5, %s520_s8  ;;  %s414_s29 = sshll.u32 %s274_s28, 4  ;;  %s415_s29 = int_to_ptr.vmem [resolvable:$true] %s414_s29 }
  0x32   : > { %v286_v5 = vld [vmem:[#allocation5 + $0x50] sm:$0xff]  ;;  %v285_v6 = vld [vmem:[#allocation5 + $0x48] sm:$0xff]  ;;  %v284_v7 = vld [vmem:[#allocation5 + $0x40] sm:$0xff]  ;;  %s416_s30 = sshll.u32 %s412_s11, 4  ;;  %s402_s16 = scalar_lea.sflag [#allocation4], %s892_s22  ;;  %s417_s30 = int_to_ptr.hbm [resolvable:$true] %s416_s30 }
  0x33   : > { %297 = vmatpush.msra.mxu0 %v290_v1  ;;  %v283_v8 = vld [vmem:[#allocation5 + $0x38] sm:$0xff]  ;;  %v282_v9 = vld [vmem:[#allocation5 + $0x30] sm:$0xff]  ;;  %v281_v10 = vld [vmem:[#allocation5 + $0x28] sm:$0xff]  ;;  %s700_s25 = sshra.s32 %s417_s30, 4  ;;  %s706_s17 = scalar_lea.hbm %s955_s5, 16  ;;  %s701_s25 = int_to_ptr.hbm [resolvable:$true] %s700_s25 }
  0x34   : > { %v280_v11 = vld [vmem:[#allocation5 + $0x20] sm:$0xff]  ;;  %v279_v12 = vld [vmem:[#allocation5 + $0x18] sm:$0xff]  ;;  %v278_v13 = vld [vmem:[#allocation5 + $0x10] sm:$0xff]  ;;  %s702_s7 = scalar_lea.hbm %s701_s25, 8  ;;  %p707_p12 = scmp.lt.s32.totalorder %s701_s25, %s955_s5 }
  0x35   : > { %298 = vmatpush.msra.mxu0 %v289_v2  ;;  %v277_v14 = vld [vmem:[#allocation5 + $0x8] sm:$0xff]  ;;  %v276_v15 = vld [vmem:[#allocation5] sm:$0xff]  ;;  %v275_v16 = vld [vmem:[%s898_s13] sm:$0xff]  ;;  %p703_p1 = scmp.ne.s32.totalorder %s701_s25, %s702_s7  ;;  %p708_p7 = scmp.lt.s32.totalorder %s706_s17, %s702_s7 }
  0x36   : > { %v375_v17 = vld [vmem:[#allocation7 + $0x78] sm:$0xff]  ;;  %v374_v18 = vld [vmem:[#allocation7 + $0x70] sm:$0xff]  ;;  %v373_v19 = vld [vmem:[#allocation7 + $0x68] sm:$0xff] }
  0x37   : > { %299 = vmatpush.msra.mxu0 %v288_v3  ;;  %380 = vmatpush.msra.mxu1 %v375_v17  ;;  %v372_v20 = vld [vmem:[#allocation7 + $0x60] sm:$0xff]  ;;  %v592_v21 = vld [vmem:[%s952_s2] ss:$0 sm:$0xff]  ;;  %v371_v22 = vld [vmem:[#allocation7 + $0x58] sm:$0xff]  ;;  %p704_p3 = pnand %p703_p1, %p861_p4  ;;  %p709_p8 = por %p708_p7, %p707_p12 }
  0x38   : > { %v370_v23 = vld [vmem:[#allocation7 + $0x50] sm:$0xff]  ;;  %v369_v25 = vld [vmem:[#allocation7 + $0x48] sm:$0xff]  ;;  %v368_v27 = vld [vmem:[#allocation7 + $0x40] sm:$0xff] }
  0x39   : > { %300 = vmatpush.msra.mxu0 %v287_v4  ;;  %381 = vmatpush.msra.mxu1 %v374_v18  ;;  %v367_v29 = vld [vmem:[#allocation7 + $0x38] sm:$0xff]  ;;  %v366_v31 = vld [vmem:[#allocation7 + $0x30] sm:$0xff]  ;;  %v365_v33 = vld [vmem:[#allocation7 + $0x28] sm:$0xff]  ;;  %p705_p5 = pneg %p704_p3 }
  0x3a   : > { %v364_v36 = vld [vmem:[#allocation7 + $0x20] sm:$0xff]  ;;  %v363_v39 = vld [vmem:[#allocation7 + $0x18] sm:$0xff]  ;;  %v362_v42 = vld [vmem:[#allocation7 + $0x10] sm:$0xff] }
  0x3b   : > { %301 = vmatpush.msra.mxu0 %v286_v5  ;;  %382 = vmatpush.msra.mxu1 %v373_v19  ;;  %v361_v45 = vld [vmem:[#allocation7 + $0x8] sm:$0xff]  ;;  %v360_v47 = vld [vmem:[#allocation7] sm:$0xff]  ;;  %p710_p9 = pnand %p709_p8, %p705_p5 }
  0x3d   : > { %302 = vmatpush.msra.mxu0 %v285_v6  ;;  %383 = vmatpush.msra.mxu1 %v372_v20 }
  0x3f   : > { %303 = vmatpush.msra.mxu0 %v284_v7  ;;  %384 = vmatpush.msra.mxu1 %v371_v22 }
  0x41   : > { %304 = vmatpush.msra.mxu0 %v283_v8  ;;  %385 = vmatpush.msra.mxu1 %v370_v23 }
  0x43   : > { %305 = vmatpush.msra.mxu0 %v282_v9  ;;  %386 = vmatpush.msra.mxu1 %v369_v25 }
  0x45   : > { %306 = vmatpush.msra.mxu0 %v281_v10  ;;  %387 = vmatpush.msra.mxu1 %v368_v27 }
  0x47   : > { %307 = vmatpush.msra.mxu0 %v280_v11  ;;  %388 = vmatpush.msra.mxu1 %v367_v29  ;;  %v593_v11 = vld [vmem:[%s954_s4] ss:$0 sm:$0xff] }
  0x49   : > { %308 = vmatpush.msra.mxu0 %v279_v12  ;;  %389 = vmatpush.msra.mxu1 %v366_v31 }
  0x4b   : > { %309 = vmatpush.msra.mxu0 %v278_v13  ;;  %390 = vmatpush.msra.mxu1 %v365_v33 }
  0x4d   : > { %310 = vmatpush.msra.mxu0 %v277_v14  ;;  %391 = vmatpush.msra.mxu1 %v364_v36 }
  0x4f   : > { %311 = vmatpush.msra.mxu0 %v276_v15  ;;  %392 = vmatpush.msra.mxu1 %v363_v39 }
  0x50   : > { %312 = vmatmul.f32.vlgmr.msra.gmra.mxu0 %v275_v16 }
  0x51   : > { %393 = vmatpush.msra.mxu1 %v362_v42 }
  0x53   : > { %394 = vmatpush.msra.mxu1 %v361_v45 }
  0x55   : > { %395 = vmatpush.msra.mxu1 %v360_v47 }
  0xcd   : > { %v313_v24 = vpop.f32.mrf.mxu0 }
  0xce   : > { %v314_v26 = vadd.f32 %v592_v21, %v313_v24 }
  0xd0   : > { %v317_v28 = vmul.f32 0.70710677, %v314_v26  ;;  %v316_v8 = vmul.f32 0.5, %v314_v26 }
  0xd2   : > { %v318_v30 = vmul.f32 %v317_v28, %v317_v28 }
  0xd4   : > { %v319_v32 = vmin.f32 %v318_v30, 16.0 }
  0xd6   : > { %v320_v34 = vmul.f32 2.1237322e-06, %v319_v32  ;;  %v331_v35 = vmul.f32 3.8918573e-05, %v319_v32 }
  0xd8   : > { %v321_v37 = vadd.f32 0.00028619796, %v320_v34  ;;  %v332_v38 = vadd.f32 0.001143296, %v331_v35 }
  0xda   : > { %v322_v40 = vmul.f32 %v321_v37, %v319_v32  ;;  %v333_v41 = vmul.f32 %v332_v38, %v319_v32 }
  0xdc   : > { %v334_v43 = vadd.f32 0.014752088, %v333_v41  ;;  %v323_v44 = vadd.f32 0.0036580483, %v322_v40 }
  0xde   : > { %v335_v46 = vmul.f32 %v334_v43, %v319_v32  ;;  %v324_v49 = vmul.f32 %v323_v44, %v319_v32 }
  0xe0   : > { %v336_v48 = vadd.f32 0.112945676, %v335_v46  ;;  %v325_v52 = vadd.f32 0.05243302, %v324_v49 }
  0xe2   : > { %v337_v50 = vmul.f32 %v336_v48, %v319_v32  ;;  %v326_v55 = vmul.f32 %v325_v52, %v319_v32 }
  0xe4   : > { %v338_v51 = vadd.f32 0.4994258, %v337_v50  ;;  %v327_v56 = vadd.f32 0.18741608, %v326_v55 }
  0xe6   : > { %v339_v53 = vmul.f32 %v338_v51, %v319_v32  ;;  %v328_v58 = vmul.f32 %v327_v56, %v319_v32 }
  0xe8   : > { %v340_v54 = vadd.f32 1.0, %v339_v53  ;;  %v329_v62 = vadd.f32 1.1283791, %v328_v58 }
  0xea   : > { %594 = vrcp.f32 %v340_v54  ;;  %v352_v61 = vand.u32 2147483648, %v340_v54  ;;  %v350_v0 = vand.u32 2147483647, %v340_v54  ;;  %vm346_vm1 = vweird.f32 %v340_v54 }
  0xeb   : > { %v330_v3 = vmul.f32 %v329_v62, %v317_v28 }
  0xec   : > { %v353_v2 = vor.u32 1.1754944e-38, %v352_v61  ;;  %vm351_vm3 = vcmp.eq.f32.partialorder %v350_v0, 8.507059e+37 }
  0xf0   : > { %v595_v57 = vpop.eup %594 }
  0xf1   : > { %v342_v59 = vmul.f32 %v595_v57, %v340_v54  ;;  %vm347_vm0 = vweird.f32 %v595_v57 }
  0xf2   : > { %vm348_vm2 = vmor %vm346_vm1, %vm347_vm0 }
  0xf3   : > { %v343_v60 = vsub.f32 1.0, %v342_v59 }
  0xf5   : > { %v344_v63 = vmul.f32 %v595_v57, %v343_v60 }
  0xf7   : > { %v345_v1 = vadd.f32 %v595_v57, %v344_v63 }
  0xf9   : > { %v349_v4 = vsel %vm348_vm2, %v595_v57, %v345_v1 }
  0xfa   : > { %v354_v5 = vsel %vm351_vm3, %v353_v2, %v349_v4 }
  0xfb   : > { %v355_v6 = vmul.f32 %v354_v5, %v330_v3 }
  0xfd   : > { %v518_v7 = vclamps-f32 %v355_v6, 1.0 }
  0xff   : > { %v358_v9 = vadd.f32 1.0, %v518_v7 }
 0x101   : > { %v359_v10 = vmul.f32 %v358_v9, %v316_v8 }
 0x103   : > { %396 = vmatmul.f32.vlgmr.msra.gmra.mxu1 %v359_v10 }
 0x180   : > { %v397_v12 = vpop.f32.mrf.mxu1 }
 0x181   : > { %v398_v13 = vadd.f32 %v593_v11, %v397_v12 }
 0x183   : > { %400 = vst [vmem:[%s274_s28] sm:$0xff] %v398_v13 }
 0x184   : > { %713 = shalt.err (!%p710_p9)
}
 0x185   : > { %533 = dma.vmem_to_hbm [thread:$0]  (%p861_p4), %s415_s29, 128, %s417_s30, %s402_s16  }
 0x186 PF: > { %s428_s22 = sand.u32 1, %s744_s18   ;;  %p962_p10 = scmp.ge.s32.totalorder %s756_s21, 2 }
 0x187   : > { %s429_s9 = scalar_lea.sflag [#allocation4], %s428_s22 }
 0x188   : > { %p547_p13 = pnand %p962_p10, %p865_p6 }
 0x18a   : > { %p548_p11 = pneg %p547_p13 }
 0x18c   : > { %739 = dma.done.wait (%p548_p11), %s429_s9, 128  }
 0x18d   : > { %741 = vsyncadd (%p548_p11), %s429_s9, 4294967168  ;;  %p19_p0 = scmp.ge.s32.totalorder %s835_s12, 4   ;;  %s963_s18 = smov %s748_s19 }
 0x18e   : > { %s964_s19 = smov %s752_s20  ;;  %s965_s20 = smov %s846_s15 }
 0x18f   : > { %s966_s21 = smov %s835_s12  ;;  %21 = sbr.rel (!%p19_p0) target bundleno = 6 (0x6), region = 93 }
 0x194   :  { %435 = vsyncpa [#allocation3], 1 }
 0x195   :  { %437 = vsyncpa [#allocation3 + $0x1], 1 }
 0x196   :  { %438 = vsyncpa [#allocation6], 1 }
 0x197   :  { %439 = vsyncpa [#allocation4], 1 }
 0x198   :  { %441 = vsyncpa [#allocation4 + $0x1], 1 }

</bundles_post_ra>
